<compile_context>
chip_gen: v7x
topology: tpu7x:2x2x1
jax: 0.10.0
libtpu: 0.0.40
codegen_flags: <defaults>
</compile_context>

<pallas_src>
import functools

import numpy as np

import jax
import jax.numpy as jnp
from jax import lax
from jax.experimental import pallas as pl
from jax.experimental.pallas import tpu as pltpu


_LANE = 128
_SUBLANE = 8
_VMEM_BUDGET = 20 * 1024 * 1024   # total working-set target (fits v5e/v6e/v7x)
_VMEM_LIMIT = 32 * 1024 * 1024    # scoped-VMEM limit handed to Mosaic


def _halve(n):
    # Output size of AvgPool2d(kernel=3, stride=2, padding=1).
    return (n + 1) // 2


def _out_hw(h, w, ratio):
    for _ in range(ratio):
        h, w = _halve(h), _halve(w)
    return h, w


def _pad_lanes(n):
    return max(_LANE, ((n + _LANE - 1) // _LANE) * _LANE)


# --------------------------- pooling matrices ------------------------------

def _pool_matrix_np(n):
    """A[i, o] = 1 if input index i lies inside the 3-wide window of output o."""
    no = _halve(n)
    i = np.arange(n)[:, None]
    o = np.arange(no)[None, :]
    return ((i >= 2 * o - 1) & (i <= 2 * o + 1)).astype(np.float64)


def _combined_pool_matrix(h, w, ratio):
    """Composite matrix M (H*W, Hf*Wf) for `ratio` stacked AvgPool2d(3,2,1)."""
    ah = np.eye(h, dtype=np.float64)
    aw = np.eye(w, dtype=np.float64)
    ph, pw = h, w
    for _ in range(ratio):
        ah = ah @ _pool_matrix_np(ph)
        aw = aw @ _pool_matrix_np(pw)
        ph, pw = _halve(ph), _halve(pw)
    m = np.einsum("ho,wq->hwoq", ah, aw).reshape(h * w, ph * pw)
    m *= 1.0 / (9.0 ** ratio)
    return jnp.asarray(m, dtype=jnp.float32)


def _pool_matrix_iota(in_size, out_size, scale):
    """Same membership matrix, built in-kernel from 2-D iotas (no operand DMA)."""
    i = lax.broadcasted_iota(jnp.int32, (in_size, out_size), 0)
    o = lax.broadcasted_iota(jnp.int32, (in_size, out_size), 1)
    hit = (i >= 2 * o - 1) & (i <= 2 * o + 1)
    return hit.astype(jnp.float32) * jnp.float32(scale)


# ------------------------------- kernels -----------------------------------

def _flat_pool_kernel(x_ref, m_ref, o_ref):
    # x_ref: (Bc, H*W), m_ref: (H*W, Hf*Wf) resident, o_ref: (Bc, Hf*Wf).
    x = x_ref[...]
    if x.dtype != jnp.float32:
        x = x.astype(jnp.float32)
    o_ref[...] = jnp.dot(x, m_ref[...],
                         preferred_element_type=jnp.float32).astype(o_ref.dtype)


def _staged_pool_kernel(x_ref, o_ref, *, ratio):
    # x_ref: (Bc, H, W); o_ref: (Bc, Hf, Wf).  Each stage = two tall-M 2-D MXU
    # matmuls; spatial orientation flips per stage and is fixed up (on the
    # smallest intermediate) only for odd `ratio`.
    z = x_ref[...].astype(jnp.float32)
    bc = z.shape[0]
    for _ in range(ratio):
        _, p, q = z.shape
        po, qo = _halve(p), _halve(q)
        aq_t = _pool_matrix_iota(q, qo, 1.0 / 9.0)   # 1/9 folded into q side
        ap_t = _pool_matrix_iota(p, po, 1.0)
        t = jnp.dot(z.reshape(bc * p, q), aq_t,
                    preferred_element_type=jnp.float32)          # (bc*p, qo)
        t = jnp.swapaxes(t.reshape(bc, p, qo), 1, 2)             # (bc, qo, p)
        z = jnp.dot(t.reshape(bc * qo, p), ap_t,
                    preferred_element_type=jnp.float32).reshape(bc, qo, po)
    if ratio % 2 == 1:
        z = jnp.swapaxes(z, 1, 2)
    o_ref[...] = z.astype(o_ref.dtype)


# ------------------------------ wrappers ------------------------------------

def _choose_rows(b, bytes_per_row, budget, sublane_align):
    """Images (N*C rows) per grid step from a real VMEM budget."""
    bc = max(1, int(budget) // max(1, int(bytes_per_row)))
    if bc >= b:
        return b
    if sublane_align:
        bc = max(_SUBLANE, (bc // _SUBLANE) * _SUBLANE)
    return min(bc, b)


def _input_injection_flat(x, ratio):
    n, c, h, w = x.shape
    hf, wf = _out_hw(h, w, ratio)
    b, hw, hwf = n * c, h * w, hf * wf

    xf = x.reshape(b, hw)                        # contiguous dims -> free reshape
    m = _combined_pool_matrix(h, w, ratio)       # (hw, hwf), fetched into VMEM once

    itemsize = x.dtype.itemsize
    in_row = 2 * _pad_lanes(hw) * itemsize                           # dbl-buf input
    in_f32 = _pad_lanes(hw) * 4 if itemsize < 4 else 0               # in-kernel upcast
    out_row = 2 * _pad_lanes(hwf) * itemsize + _pad_lanes(hwf) * 4   # dbl-buf out + f32 acc
    m_bytes = 2 * hw * _pad_lanes(hwf) * 4                           # resident pool matrix
    budget = max(_VMEM_BUDGET - m_bytes, 1 << 20)
    bc = _choose_rows(b, in_row + in_f32 + out_row, budget, sublane_align=True)

    out = pl.pallas_call(
        _flat_pool_kernel,
        out_shape=jax.ShapeDtypeStruct((b, hwf), x.dtype),
        grid_spec=pltpu.PrefetchScalarGridSpec(
            num_scalar_prefetch=0,
            grid=(pl.cdiv(b, bc),),
            in_specs=[
                pl.BlockSpec((bc, hw), lambda i: (i, 0)),
                pl.BlockSpec((hw, hwf), lambda i: (0, 0)),   # same block every step
            ],
            out_specs=pl.BlockSpec((bc, hwf), lambda i: (i, 0)),
        ),
        compiler_params=pltpu.CompilerParams(
            dimension_semantics=("parallel",),
            vmem_limit_bytes=_VMEM_LIMIT),
    )(xf, m)
    return out.reshape(n, c, hf, wf)


def _input_injection_staged(x, ratio):
    n, c, h, w = x.shape
    hf, wf = _out_hw(h, w, ratio)
    b = n * c
    xf = x.reshape(b, h, w)

    itemsize = x.dtype.itemsize
    per_img = (2 * h * _pad_lanes(w) * itemsize        # double-buffered input block
               + 2 * h * _pad_lanes(w) * 4             # f32 copy + largest intermediate
               + 2 * hf * _pad_lanes(wf) * itemsize)   # double-buffered output block
    # TODO(synk): for giant images where a single image exceeds the budget (e.g.
    # 2048x2048 f32), add an H-tiling grid axis with a 1-row halo instead of
    # whole-image blocks.
    bc = _choose_rows(b, per_img, _VMEM_BUDGET, sublane_align=False)

    out = pl.pallas_call(
        functools.partial(_staged_pool_kernel, ratio=ratio),
        out_shape=jax.ShapeDtypeStruct((b, hf, wf), x.dtype),
        grid_spec=pltpu.PrefetchScalarGridSpec(
            num_scalar_prefetch=0,
            grid=(pl.cdiv(b, bc),),
            in_specs=[pl.BlockSpec((bc, h, w), lambda i: (i, 0, 0))],
            out_specs=pl.BlockSpec((bc, hf, wf), lambda i: (i, 0, 0)),
        ),
        compiler_params=pltpu.CompilerParams(
            dimension_semantics=("parallel",),
            vmem_limit_bytes=_VMEM_LIMIT),
    )(xf)
    return out.reshape(n, c, hf, wf)


def input_injection(x, ratio):
    """Equivalent of InputInjection(ratio).forward(x), x in NCHW."""
    if ratio <= 0:
        return x
    _, _, h, w = x.shape
    hf, wf = _out_hw(h, w, ratio)
    hw, hwf = h * w, hf * wf
    # Flat (lane-dense) path: W is lane-sparse and the composite matrix stays small.
    if w < _LANE and hw <= 4096 and hw * _pad_lanes(hwf) * 4 <= (2 << 20):
        return _input_injection_flat(x, ratio)
    return _input_injection_staged(x, ratio)


# ------------------------- reference & self-test ---------------------------

def _reference_avg_pool(x):
    s = lax.reduce_window(
        x, 0.0, lax.add,
        window_dimensions=(1, 1, 3, 3),
        window_strides=(1, 1, 2, 2),
        padding=((0, 0), (0, 0), (1, 1), (1, 1)),
    )
    return s / 9.0


def _reference_input_injection(x, ratio):
    for _ in range(ratio):
        x = _reference_avg_pool(x)
    return x


if __name__ == "__main__":
    key = jax.random.PRNGKey(0)
    x = jax.random.normal(key, (2, 4, 16, 16), dtype=jnp.float32)
    ratio = 2

    out = jax.block_until_ready(input_injection(x, ratio))
    ref = _reference_input_injection(x, ratio)

    assert out.shape == ref.shape, (out.shape, ref.shape)
    assert jnp.allclose(out, ref, atol=1e-5, rtol=1e-5), "mismatch vs reference"
    print("KERNEL_OK")
</pallas_src>

<mosaic_0001>
module attributes {stable_mosaic.version = 11 : i64} {
  func.func @_flat_pool_kernel(%arg0: i32, %arg1: memref<8x256xf32, #tpu.memory_space<vmem>>, %arg2: memref<256x16xf32, #tpu.memory_space<vmem>>, %arg3: memref<8x16xf32, #tpu.memory_space<vmem>>) attributes {dimension_semantics = [#tpu.dimension_semantics<parallel>], iteration_bounds = array<i64: 1>, scalar_prefetch = 0 : i64, scratch_operands = 0 : i64, tpu.core_type = #tpu.core_type<tc>, window_params = [{transform_indices = @transform_0, window_bounds = array<i64: 8, 256>}, {pipeline_mode = #tpu.pipeline_mode<synchronous>, transform_indices = @transform_1, window_bounds = array<i64: 256, 16>}, {transform_indices = @transform_2, window_bounds = array<i64: 8, 16>}]} {
    %c0 = arith.constant 0 : index
    %c0_0 = arith.constant 0 : index
    %0 = vector.load %arg1[%c0, %c0_0] : memref<8x256xf32, #tpu.memory_space<vmem>>, vector<8x256xf32>
    %c0_1 = arith.constant 0 : index
    %c0_2 = arith.constant 0 : index
    %1 = vector.load %arg2[%c0_1, %c0_2] : memref<256x16xf32, #tpu.memory_space<vmem>>, vector<256x16xf32>
    %cst = arith.constant dense<0.000000e+00> : vector<8x16xf32>
    %2 = tpu.matmul %0, %1, %cst {dimension_numbers = #tpu.dot_dimension_numbers<[1], [0], [0], [1], [0, 0, 1, 1], [], []>} : vector<8x256xf32>, vector<256x16xf32>, vector<8x16xf32> -> vector<8x16xf32>
    %c0_3 = arith.constant 0 : index
    %c0_4 = arith.constant 0 : index
    %3 = vector.load %arg3[%c0_3, %c0_4] : memref<8x16xf32, #tpu.memory_space<vmem>>, vector<8x16xf32>
    tpu.vector_store %arg3[%c0_3, %c0_4], %2 {strides = array<i32>} : memref<8x16xf32, #tpu.memory_space<vmem>>, vector<8x16xf32>,
    return
  }
  func.func @transform_0(%arg0: i32) -> (i32, i32) {
    %c0_i32 = arith.constant 0 : i32
    %c0_i32_0 = arith.constant 0 : i32
    return %arg0, %c0_i32 : i32, i32
  }
  func.func @transform_1(%arg0: i32) -> (i32, i32) {
    %c0_i32 = arith.constant 0 : i32
    %c0_i32_0 = arith.constant 0 : i32
    %c0_i32_1 = arith.constant 0 : i32
    return %c0_i32, %c0_i32_0 : i32, i32
  }
  func.func @transform_2(%arg0: i32) -> (i32, i32) {
    %c0_i32 = arith.constant 0 : i32
    %c0_i32_0 = arith.constant 0 : i32
    return %arg0, %c0_i32 : i32, i32
  }
}

</mosaic_0001>

<bundles_post_ra>
// kernel: tpu_custom_call.1
= control target key start
LH: loop header
LB: loop body
LE: loop exit
PB: predicated region body
PF: predicated region fallthrough
CT: control target
= control target key end

     0   :  { %s354_s0 = inlined_call_operand.vmem [shape: f32[8,256], index: 0, kind: input, shape index: {}]   ;;  %s355_s1 = inlined_call_operand.vmem [shape: f32[256,16], index: 1, kind: input, shape index: {}]   ;;  %s356_s2 = inlined_call_operand.hbm [shape: f32[8,16], index: 2, kind: output, shape index: {}]  }
   0x1   :  { %v30_v0 = vld [vmem:[%s355_s1 + $0x80] sm:$0xff]  ;;  %v31_v1 = vld [vmem:[%s355_s1 + $0x88] sm:$0xff]  ;;  %v32_v5 = vld [vmem:[%s355_s1 + $0x90] sm:$0xff] }
   0x2   :  { %v14_v2 = vld [vmem:[%s355_s1] sm:$0xff]  ;;  %v167_v3 = vpack.c.bf16 %v31_v1, %v30_v0  ;;  %v15_v4 = vld [vmem:[%s355_s1 + $0x8] sm:$0xff]  ;;  %v33_v6 = vld [vmem:[%s355_s1 + $0x98] sm:$0xff] }
   0x3   :  { %v169_v7 = vpack.c.bf16 %v15_v4, %v14_v2  ;;  %v171_v8 = vpack.c.bf16 %v33_v6, %v32_v5  ;;  %v16_v9 = vld [vmem:[%s355_s1 + $0x10] sm:$0xff]  ;;  %v17_v10 = vld [vmem:[%s355_s1 + $0x18] sm:$0xff]  ;;  %v34_v11 = vld [vmem:[%s355_s1 + $0xa0] sm:$0xff] }
   0x4   :  { %168 = vmatprep.subr.bf16.mxu0 %v167_v3  ;;  %v35_v12 = vld [vmem:[%s355_s1 + $0xa8] sm:$0xff]  ;;  %v173_v13 = vpack.c.bf16 %v17_v10, %v16_v9  ;;  %v18_v15 = vld [vmem:[%s355_s1 + $0x20] sm:$0xff]  ;;  %v36_v17 = vld [vmem:[%s355_s1 + $0xb0] sm:$0xff] }
   0x5   :  { %170 = vmatpush3.bf16.msra.mxu0 %v169_v7  ;;  %v175_v14 = vpack.c.bf16 %v35_v12, %v34_v11  ;;  %v19_v16 = vld [vmem:[%s355_s1 + $0x28] sm:$0xff]  ;;  %v37_v18 = vld [vmem:[%s355_s1 + $0xb8] sm:$0xff]  ;;  %v20_v21 = vld [vmem:[%s355_s1 + $0x30] sm:$0xff] }
   0x6   :  { %172 = vmatprep.subr.bf16.mxu0 %v171_v8  ;;  %v177_v19 = vpack.c.bf16 %v19_v16, %v18_v15  ;;  %v179_v20 = vpack.c.bf16 %v37_v18, %v36_v17  ;;  %v21_v22 = vld [vmem:[%s355_s1 + $0x38] sm:$0xff]  ;;  %v38_v23 = vld [vmem:[%s355_s1 + $0xc0] sm:$0xff]  ;;  %v39_v24 = vld [vmem:[%s355_s1 + $0xc8] sm:$0xff] }
   0x7   :  { %v13_v25 = vld [vmem:[%s354_s0 + $0x8] sm:$0xff] }
   0x8   :  { %110 = vmatprep.mubr.f32.mxu0 %v13_v25 }
   0x9   :  { %174 = vmatpush3.bf16.msra.mxu0 %v173_v13 }
   0xa   :  { %176 = vmatprep.subr.bf16.mxu0 %v175_v14 }
   0xb   :  { %7 = vsyncpa [#allocation3], 0  ;;  %v181_v26 = vpack.c.bf16 %v21_v22, %v20_v21  ;;  %v183_v27 = vpack.c.bf16 %v39_v24, %v38_v23  ;;  %v22_v28 = vld [vmem:[%s355_s1 + $0x40] sm:$0xff]  ;;  %v23_v29 = vld [vmem:[%s355_s1 + $0x48] sm:$0xff]  ;;  %s224_s21 = smov [#allocation2]   ;;  %vm116_vm0 = vcmask 130048  }
   0xc   :  { %v40_v30 = vld [vmem:[%s355_s1 + $0xd0] sm:$0xff]  ;;  %v41_v31 = vld [vmem:[%s355_s1 + $0xd8] sm:$0xff]  ;;  %v185_v32 = vpack.c.bf16 %v23_v29, %v22_v28  ;;  %v42_v36 = vld [vmem:[%s355_s1 + $0xe0] sm:$0xff]  ;;  %s124_s22 = sshll.u32 %s224_s21, 4  ;;  %s125_s22 = int_to_ptr.vmem [resolvable:$true] %s124_s22 }
   0xd   :  { %178 = vmatpush3.bf16.msra.mxu0 %v177_v19  ;;  %v187_v33 = vpack.c.bf16 %v41_v31, %v40_v30  ;;  %v24_v34 = vld [vmem:[%s355_s1 + $0x50] sm:$0xff]  ;;  %v25_v35 = vld [vmem:[%s355_s1 + $0x58] sm:$0xff]  ;;  %v43_v37 = vld [vmem:[%s355_s1 + $0xe8] sm:$0xff]  ;;  %s200_s23 = scalar_lea.vmem %s125_s22, 128  ;;  %p205_p1 = scmp.lt.s32.totalorder %s125_s22, %s125_s22 }
   0xe   :  { %180 = vmatprep.subr.bf16.mxu0 %v179_v20  ;;  %v189_v38 = vpack.c.bf16 %v25_v35, %v24_v34  ;;  %v191_v39 = vpack.c.bf16 %v43_v37, %v42_v36  ;;  %v26_v40 = vld [vmem:[%s355_s1 + $0x60] sm:$0xff]  ;;  %v27_v41 = vld [vmem:[%s355_s1 + $0x68] sm:$0xff]  ;;  %v44_v42 = vld [vmem:[%s355_s1 + $0xf0] sm:$0xff]  ;;  %p201_p0 = scmp.ne.s32.totalorder %s125_s22, %s200_s23  ;;  %p206_p2 = scmp.lt.s32.totalorder %s200_s23, %s200_s23 }
   0xf   :  { %v45_v43 = vld [vmem:[%s355_s1 + $0xf8] sm:$0xff]  ;;  %v193_v44 = vpack.c.bf16 %v27_v41, %v26_v40  ;;  %v28_v46 = vld [vmem:[%s355_s1 + $0x70] sm:$0xff]  ;;  %v12_v49 = vld [vmem:[%s354_s0] sm:$0xff] }
  0x10   :  { %v195_v45 = vpack.c.bf16 %v45_v43, %v44_v42  ;;  %v29_v47 = vld [vmem:[%s355_s1 + $0x78] sm:$0xff]  ;;  %p207_p3 = por %p206_p2, %p205_p1 }
  0x11   :  { %182 = vmatpush3.bf16.msra.mxu0 %v181_v26  ;;  %v197_v48 = vpack.c.bf16 %v29_v47, %v28_v46 }
  0x12   :  { %184 = vmatprep.subr.bf16.mxu0 %v183_v27  ;;  %p208_p4 = pnand %p207_p3, %p201_p0 }
  0x15   :  { %186 = vmatpush3.bf16.msra.mxu0 %v185_v32 }
  0x16   :  { %188 = vmatprep.subr.bf16.mxu0 %v187_v33 }
  0x19   :  { %190 = vmatpush3.bf16.msra.mxu0 %v189_v38 }
  0x1a   :  { %192 = vmatprep.subr.bf16.mxu0 %v191_v39 }
  0x1d   :  { %194 = vmatpush3.bf16.msra.mxu0 %v193_v44 }
  0x1e   :  { %196 = vmatprep.subr.bf16.mxu0 %v195_v45 }
  0x21   :  { %198 = vmatpush3.bf16.msra.mxu0 %v197_v48 }
  0x24   :  { %111 = vmatmul.mubr.f32.vlgmr.msra.gmra.mrb[0].mxu0 %v12_v49 }
  0xf7   :  { %v164_v50 = vpop.f32.mrb[0].mxu0 }
  0xf8   :  { %v165_v51 = vpop.f32.mrb[1].mxu0 }
  0xf9   :  { %v166_v52 = vadd.f32 %v165_v51, %v164_v50 }
  0xfb   :  { %117 = vst.msk [vmem:[#allocation2] sm:$0xff] %vm116_vm0, %v166_v52 }
  0xfc   :  { %211 = shalt.err (!%p208_p4)
}
  0xfd   :  { %s212_s0 = scalar_lea.hbm %s356_s2, 128 }
  0xfe   :  { %p213_p5 = scmp.ne.s32.totalorder %s356_s2, %s212_s0  ;;  %p216_p6 = scmp.lt.u32.totalorder %s212_s0, %s356_s2 }
 0x100   :  { %p218_p7 = pnand %p216_p6, %p213_p5 }
 0x102   :  { %221 = shalt.err (!%p218_p7)
}
 0x103   :  { %127 = dma.vmem_to_hbm [thread:$0]  %s125_s22, 128, %s356_s2, [#allocation3]  }
 0x104   :  { %222 = dma.done.wait [#allocation3], 128  }
 0x105   :  { %223 = vsyncadd [#allocation3], 4294967168 }
 0x106   :  { %131 = vsyncpa [#allocation3], 1 }

</bundles_post_ra>
